<compile_context>
chip_gen: v5e
topology: v5e:2x2
jax: 0.10.0
libtpu: 0.0.40
codegen_flags: <defaults>
</compile_context>

<pallas_src>
import jax
import jax.numpy as jnp
from jax.experimental import pallas as pl
from jax.experimental.pallas import tpu as pltpu


def _discretize_kernel(x_ref, t_ref, o_ref):
    """Fused sparse-layer + binarize on one (1, C, TILE_L) tile.

    x_ref: (1, C, TILE_L) activations (NCL layout, L on lanes)
    t_ref: (1, C, 1) per-channel effective thresholds (= max(thresh, 0)),
           broadcast along the lane (L) axis
    o_ref: (1, C, TILE_L) output tile in {0., 1.}
    """
    o_ref[...] = (x_ref[...] > t_ref[...]).astype(o_ref.dtype)


def _pick_tile_l(L, C, target_block_bytes=2 << 20):
    """Largest lane-dense (multiple of 128) divisor of L with ~target bytes/block."""
    cap = max(128, (target_block_bytes // 4) // max(C, 1))  # f32 elems per block / C
    if L <= cap:
        return L
    if L % 128 != 0:
        # Fall back to full-dim block (always legal); only hit for odd L.
        return L
    t = (min(cap, L) // 128) * 128
    while t > 128 and L % t != 0:
        t -= 128
    return t if L % t == 0 else L


def discretize_motifs_in(x_ncl, thresh):
    """DiscretizeMotifsIn(sparse_layer) forward.

    Args:
      x_ncl:  (N, C, L) float32 activations (PyTorch NCL convention).
      thresh: (C,) float32 per-channel sparsity thresholds.

    Returns:
      (N, C, L) float32 tensor of 0./1. values (matches `.float()`).
    """
    N, C, L = x_ncl.shape
    tile_l = _pick_tile_l(L, C)
    grid = (N, L // tile_l)

    # Effective threshold: relu(x) passes "> t" and is nonzero iff x > max(t, 0).
    t_eff = jnp.maximum(thresh.astype(jnp.float32), 0.0).reshape(1, C, 1)

    return pl.pallas_call(
        _discretize_kernel,
        out_shape=jax.ShapeDtypeStruct((N, C, L), jnp.float32),
        grid_spec=pltpu.PrefetchScalarGridSpec(
            num_scalar_prefetch=0,
            grid=grid,
            in_specs=[
                # x: one batch row, full channel extent, lane-dense L tile.
                pl.BlockSpec((1, C, tile_l), lambda n, l: (n, 0, l)),
                # thresholds: constant block index -> effectively resident.
                pl.BlockSpec((1, C, 1), lambda n, l: (0, 0, 0)),
            ],
            out_specs=pl.BlockSpec((1, C, tile_l), lambda n, l: (n, 0, l)),
        ),
        compiler_params=pltpu.CompilerParams(
            dimension_semantics=("parallel", "parallel")),
    )(x_ncl, t_eff)


def _reference(x_ncl, thresh):
    """Pure-JAX reference of sparse layer + DiscretizeMotifsIn."""
    t = thresh.reshape(1, -1, 1)
    y = jnp.maximum(x_ncl, 0.0)
    y = jnp.where(y > t, y, 0.0)
    return (y != 0).astype(jnp.float32)


if __name__ == "__main__":
    key = jax.random.PRNGKey(0)

    # Small shapes consistent with the module: (batch, motif_channels, seq_len).
    N, C, L = 2, 32, 256

    kx, _ = jax.random.split(key)
    x = jax.random.normal(kx, (N, C, L), dtype=jnp.float32)

    # Deterministic per-channel thresholds (include a negative one to exercise
    # the max(t, 0) edge case).
    thresh = jnp.linspace(-0.2, 1.5, C, dtype=jnp.float32)

    out = discretize_motifs_in(x, thresh)
    out = jax.block_until_ready(out)

    ref = _reference(x, thresh)
    assert out.shape == (N, C, L)
    assert out.dtype == jnp.float32
    assert bool(jnp.all(out == ref))
    # output is strictly binary
    assert bool(jnp.all((out == 0.0) | (out == 1.0)))

    print("KERNEL_OK")
</pallas_src>

<mosaic_0001>
module attributes {stable_mosaic.version = 11 : i64} {
  func.func @_discretize_kernel(%arg0: i32, %arg1: i32, %arg2: memref<1x32x256xf32, #tpu.memory_space<vmem>>, %arg3: memref<1x32x1xf32, #tpu.memory_space<vmem>>, %arg4: memref<1x32x256xf32, #tpu.memory_space<vmem>>) attributes {dimension_semantics = [#tpu.dimension_semantics<parallel>, #tpu.dimension_semantics<parallel>], iteration_bounds = array<i64: 2, 1>, scalar_prefetch = 0 : i64, scratch_operands = 0 : i64, tpu.core_type = #tpu.core_type<tc>, window_params = [{transform_indices = @transform_0, window_bounds = array<i64: 1, 32, 256>}, {pipeline_mode = #tpu.pipeline_mode<synchronous>, transform_indices = @transform_1, window_bounds = array<i64: 1, 32, 1>}, {transform_indices = @transform_2, window_bounds = array<i64: 1, 32, 256>}]} {
    %c0 = arith.constant 0 : index
    %c0_0 = arith.constant 0 : index
    %c0_1 = arith.constant 0 : index
    %0 = vector.load %arg2[%c0, %c0_0, %c0_1] : memref<1x32x256xf32, #tpu.memory_space<vmem>>, vector<1x32x256xf32>
    %c0_2 = arith.constant 0 : index
    %c0_3 = arith.constant 0 : index
    %c0_4 = arith.constant 0 : index
    %1 = vector.load %arg3[%c0_2, %c0_3, %c0_4] : memref<1x32x1xf32, #tpu.memory_space<vmem>>, vector<1x32x1xf32>
    %2 = vector.broadcast %1 : vector<1x32x1xf32> to vector<1x32x256xf32>
    %3 = arith.cmpf ogt, %0, %2 : vector<1x32x256xf32>
    %4 = arith.extui %3 : vector<1x32x256xi1> to vector<1x32x256xi32>
    %5 = arith.sitofp %4 : vector<1x32x256xi32> to vector<1x32x256xf32>
    %c0_5 = arith.constant 0 : index
    %c0_6 = arith.constant 0 : index
    %c0_7 = arith.constant 0 : index
    %6 = vector.load %arg4[%c0_5, %c0_6, %c0_7] : memref<1x32x256xf32, #tpu.memory_space<vmem>>, vector<1x32x256xf32>
    tpu.vector_store %arg4[%c0_5, %c0_6, %c0_7], %5 {strides = array<i32>} : memref<1x32x256xf32, #tpu.memory_space<vmem>>, vector<1x32x256xf32>,
    return
  }
  func.func @transform_0(%arg0: i32, %arg1: i32) -> (i32, i32, i32) {
    %c0_i32 = arith.constant 0 : i32
    %c0_i32_0 = arith.constant 0 : i32
    return %arg0, %c0_i32, %arg1 : i32, i32, i32
  }
  func.func @transform_1(%arg0: i32, %arg1: i32) -> (i32, i32, i32) {
    %c0_i32 = arith.constant 0 : i32
    %c0_i32_0 = arith.constant 0 : i32
    %c0_i32_1 = arith.constant 0 : i32
    %c0_i32_2 = arith.constant 0 : i32
    return %c0_i32, %c0_i32_0, %c0_i32_1 : i32, i32, i32
  }
  func.func @transform_2(%arg0: i32, %arg1: i32) -> (i32, i32, i32) {
    %c0_i32 = arith.constant 0 : i32
    %c0_i32_0 = arith.constant 0 : i32
    return %arg0, %c0_i32, %arg1 : i32, i32, i32
  }
}

</mosaic_0001>

<bundles_post_ra>
// kernel: tpu_custom_call.1
= control target key start
LH: loop header
LB: loop body
LE: loop exit
PB: predicated region body
PF: predicated region fallthrough
CT: control target
= control target key end

     0   :  { %7 = vsyncpa [#allocation3], 0  ;;  %s732_s0 = inlined_call_operand.hbm [shape: f32[2,32,256], index: 0, kind: input, shape index: {}]   ;;  %s733_s1 = inlined_call_operand.vmem [shape: f32[1,32,1], index: 1, kind: input, shape index: {}]   ;;  %s734_s2 = inlined_call_operand.hbm [shape: f32[2,32,256], index: 2, kind: output, shape index: {}]  }
   0x1   :  { %9 = vsyncpa [#allocation3 + $0x1], 0 }
   0x2   :  { %10 = vsyncpa [#allocation4], 0 }
   0x3   :  { %12 = vsyncpa [#allocation4 + $0x1], 0  ;;  %s583_s9 = smov 0   ;;  %s585_s10 = smov 0  }
   0x4   :  { %s587_s11 = smov 0   ;;  %s589_s12 = smov 0  }
   0x5   :  { %s591_s13 = smov 0   ;;  %s593_s14 = smov 0  }
   0x6 LB: > { %s353_s15 = sadd.s32 4294967295, %s560_s14   ;;  %s354_s16 = sadd.s32 4294967294, %s560_s14   ;;  %s560_s14 = sphi %s593_s14, %s18_s14   ;;  %s556_s13 = sphi %s591_s13, %s743_s13   ;;  %s552_s12 = sphi %s589_s12, %s742_s12   ;;  %s548_s11 = sphi %s587_s11, %s741_s11   ;;  %s544_s10 = sphi %s585_s10, %s740_s10   ;;  %s540_s9 = sphi %s583_s9, %s739_s9  }
   0x7   : > { %s30_s17 = sadd.s32 1, %s556_s13  ;;  %s39_s18 = sadd.s32 1, %s548_s11 }
   0x8   : > { %p32_p0 = scmp.ge.s32.totalorder %s30_s17, 2  ;;  %p46_p1 = scmp.ne.s32.totalorder %s548_s11, %s544_s10 }
   0x9   : > { %p47_p2 = scmp.eq.s32.totalorder %s560_s14, 0  ;;  %p52_p3 = scmp.ne.s32.totalorder %s544_s10, %s540_s9 }
   0xa   : > { %s745_s17 = smov (%p32_p0, %s30_s17), 0  ;;  %p53_p5 = scmp.eq.s32.totalorder %s353_s15, 0 }
   0xb   : > { %p624_p4 = por %p47_p2, %p46_p1  ;;  %s34_s20 = ssub.s32 %s556_s13, %s745_s17 }
   0xc   : > { %p99_p6 = scmp.eq.s32.totalorder %s353_s15, 1  ;;  %p37_p7 = scmp.eq.s32.totalorder %s34_s20, 0 }
   0xd   : > { %p630_p8 = por %p53_p5, %p52_p3  ;;  %p105_p10 = scmp.eq.s32.totalorder %s354_s16, 1 }
   0xe   : > { %p634_p9 = por %p99_p6, %p46_p1  ;;  %p356_p12 = scmp.ge.s32.totalorder %s560_s14, 2 }
   0xf   : > { %s639_s23 = scalar_select %p37_p7, %s548_s11, %s39_s18  }
  0x10   : > { %p641_p11 = por %p105_p10, %p52_p3  ;;  %p390_p13 = scmp.lt.s32.totalorder %s560_s14, 2 }
  0x11   : > { %s128_s25 = sand.u32 1, %s548_s11   ;;  %s376_s27 = sshll.u32 %s556_s13, 6 }
  0x12   : > { %s357_s26 = sshll.u32 %s128_s25, 6  ;;  %s139_s30 = scalar_lea.hbm %s732_s0, %s376_s27 }
  0x13   : > { %s132_s3 = scalar_lea.vmem [#allocation2], %s357_s26  ;;  %s140_s5 = sshll.u32 %s139_s30, 4  ;;  %s141_s5 = int_to_ptr.hbm [resolvable:$true] %s140_s5 }
  0x14   : > { %s142_s4 = sshll.u32 %s132_s3, 4  ;;  %p383_p0 = pnand %p390_p13, %p624_p4  ;;  %s143_s4 = int_to_ptr.vmem [resolvable:$true] %s142_s4 }
  0x15   : > { %p360_p1 = scmp.ge.s32.totalorder %s560_s14, 1  ;;  %s129_s6 = scalar_lea.sflag [#allocation3], %s128_s25 }
  0x16   : > { %s562_s7 = smov 256   ;;  %s563_s8 = smov 16  }
  0x17   : > { %385 = dma.hbm_to_vmem [thread:$0]  (!%p383_p0), %s141_s5, 1024, %s143_s4, %s129_s6, %s562_s7, %s562_s7, %s563_s8  }
  0x18   : > { %p150_p2 = scmp.lt.s32.totalorder %s560_s14, 3 }
  0x1a   : > { %p151_p3 = pnand %p360_p1, %p150_p2 }
  0x1b   : > { %s657_s15 = sand.u32 (!%p151_p3), 1, %s544_s10  }
  0x1c   : > { %154 = sbr.rel (%p151_p3) target bundleno = 168 (0xa8), region = 28  ;;  %s361_s16 = sshll.u32 (!%p151_p3), %s657_s15, 6 }
  0x1d   : > { %s157_s18 = scalar_lea.sflag (!%p151_p3), [#allocation3], %s657_s15  ;;  %s663_s19 = scalar_lea.vmem (!%p151_p3), [#allocation2], %s361_s16 }
  0x21   : > { %531 = dma.done.wait (%p630_p8), %s157_s18, 1024  }
  0x22   : > { %533 = vsyncadd (%p630_p8), %s157_s18, 4294966272  ;;  %v564_v0 = vmov 0   ;;  %v194_v1 = vld [vmem:[%s733_s1 + $0x10] sm:$0xff]  ;;  %v192_v2 = vld [vmem:[%s733_s1] sm:$0xff]  ;;  %v565_v11 = vmov 0.0   ;;  %s377_s3 = sshll.u32 %s552_s12, 6 }
  0x23   : > { %447 = vset.pattern.permute.xlu1 %v564_v0  ;;  %446 = vset.pattern.permute.xlu0 %v564_v0  ;;  %v195_v3 = vld [vmem:[%s733_s1 + $0x18] sm:$0xff]  ;;  %v193_v4 = vld [vmem:[%s733_s1 + $0x8] sm:$0xff]  ;;  %v188_v5 = vld [vmem:[%s663_s19 + $0x20] sm:$0xff]  ;;  %s181_s4 = scalar_lea.vmem [#allocation5], %s361_s16  ;;  %s262_s7 = scalar_lea.hbm %s734_s2, %s377_s3 }
  0x24   : > { %208 = vperm.xlu1 %447, %v194_v1   ;;  %198 = vperm.xlu0 %446, %v192_v2   ;;  %v189_v6 = vld [vmem:[%s663_s19 + $0x28] sm:$0xff]  ;;  %v184_v7 = vld [vmem:[%s663_s19] sm:$0xff]  ;;  %v190_v16 = vld [vmem:[%s663_s19 + $0x30] sm:$0xff]  ;;  %s263_s8 = sshll.u32 %s181_s4, 4  ;;  %s265_s12 = sshll.u32 %s262_s7, 4  ;;  %s695_s8 = int_to_ptr.vmem [resolvable:$true] %s263_s8  ;;  %s266_s12 = int_to_ptr.hbm [resolvable:$true] %s265_s12 }
  0x25   : > { %v185_v8 = vld [vmem:[%s663_s19 + $0x8] sm:$0xff]  ;;  %v191_v17 = vld [vmem:[%s663_s19 + $0x38] sm:$0xff]  ;;  %v186_v18 = vld [vmem:[%s663_s19 + $0x10] sm:$0xff]  ;;  %s249_s16 = scalar_lea.sflag [#allocation4], %s657_s15  ;;  %s492_s18 = sshra.s32 %s266_s12, 4  ;;  %s493_s18 = int_to_ptr.hbm [resolvable:$true] %s492_s18 }
  0x26   : > { %v187_v19 = vld [vmem:[%s663_s19 + $0x18] sm:$0xff]  ;;  %s494_s19 = scalar_lea.hbm %s493_s18, 64  ;;  %s498_s26 = scalar_lea.hbm %s734_s2, 128 }
  0x27   : > { %p495_p4 = scmp.ne.s32.totalorder %s493_s18, %s494_s19  ;;  %p499_p7 = scmp.lt.s32.totalorder %s493_s18, %s734_s2 }
  0x28   : > { %p500_p8 = scmp.lt.s32.totalorder %s498_s26, %s494_s19 }
  0x29   : > { %p496_p5 = pnand %p495_p4, %p634_p9 }
  0x2a   : > { %p501_p10 = por %p500_p8, %p499_p7 }
  0x2b   : > { %p497_p6 = pneg %p496_p5 }
  0x2c   : > { %213 = vperm.xlu1 %447, %v195_v3   ;;  %203 = vperm.xlu0 %446, %v193_v4  }
  0x2d   : > { %p502_p13 = pnand %p501_p10, %p497_p6 }
  0x96   : > { %v209_v9 = vpop.permute.xlu1 %208  ;;  %v199_v10 = vpop.permute.xlu0 %198 }
  0x97   : > { %vm220_vm0 = vcmp.gt.f32.partialorder %v188_v5, %v209_v9  ;;  %vm221_vm1 = vcmp.gt.f32.partialorder %v189_v6, %v209_v9  ;;  %vm216_vm2 = vcmp.gt.f32.partialorder %v184_v7, %v199_v10  ;;  %vm217_vm3 = vcmp.gt.f32.partialorder %v185_v8, %v199_v10 }
  0x98   : > { %v367_v12 = vsel %vm220_vm0, 1.0, %v565_v11  ;;  %v368_v13 = vsel %vm221_vm1, 1.0, %v565_v11  ;;  %v363_v14 = vsel %vm216_vm2, 1.0, %v565_v11  ;;  %v364_v15 = vsel %vm217_vm3, 1.0, %v565_v11 }
  0x99   : > { %244 = vst [vmem:[%s181_s4 + $0x20] sm:$0xff] %v367_v12 }
  0x9a   : > { %245 = vst [vmem:[%s181_s4 + $0x28] sm:$0xff] %v368_v13 }
  0x9b   : > { %240 = vst [vmem:[%s181_s4] sm:$0xff] %v363_v14 }
  0x9c   : > { %241 = vst [vmem:[%s181_s4 + $0x8] sm:$0xff] %v364_v15 }
  0x9e   : > { %v214_v20 = vpop.permute.xlu1 %213  ;;  %v204_v21 = vpop.permute.xlu0 %203 }
  0x9f   : > { %vm222_vm4 = vcmp.gt.f32.partialorder %v190_v16, %v214_v20  ;;  %vm223_vm5 = vcmp.gt.f32.partialorder %v191_v17, %v214_v20  ;;  %vm218_vm6 = vcmp.gt.f32.partialorder %v186_v18, %v204_v21  ;;  %vm219_vm7 = vcmp.gt.f32.partialorder %v187_v19, %v204_v21 }
  0xa0   : > { %v369_v22 = vsel %vm222_vm4, 1.0, %v565_v11  ;;  %v370_v23 = vsel %vm223_vm5, 1.0, %v565_v11  ;;  %v365_v24 = vsel %vm218_vm6, 1.0, %v565_v11  ;;  %v366_v25 = vsel %vm219_vm7, 1.0, %v565_v11 }
  0xa1   : > { %246 = vst [vmem:[%s181_s4 + $0x30] sm:$0xff] %v369_v22 }
  0xa2   : > { %247 = vst [vmem:[%s181_s4 + $0x38] sm:$0xff] %v370_v23 }
  0xa3   : > { %242 = vst [vmem:[%s181_s4 + $0x10] sm:$0xff] %v365_v24 }
  0xa4   : > { %243 = vst [vmem:[%s181_s4 + $0x18] sm:$0xff] %v366_v25 }
  0xa5   : > { %505 = shalt.err (!%p502_p13)
}
  0xa6   : > { %s566_s15 = smov 256   ;;  %s567_s21 = smov 16  }
  0xa7   : > { %380 = dma.vmem_to_hbm [thread:$0]  (%p634_p9), %s695_s8, 1024, %s266_s12, %s249_s16, %s566_s15, %s566_s15, %s567_s21  }
  0xa8 PF: > { %s280_s29 = sand.u32 1, %s540_s9   ;;  %p387_p0 = pnand %p356_p12, %p641_p11 }
  0xa9   : > { %s281_s30 = scalar_lea.sflag [#allocation4], %s280_s29 }
  0xaa   : > { %p388_p1 = pneg %p387_p0 }
  0xac   : > { %535 = dma.done.wait (%p388_p1), %s281_s30, 1024  }
  0xad   : > { %537 = vsyncadd (%p388_p1), %s281_s30, 4294966272  ;;  %s18_s14 = sadd.s32 1, %s560_s14   ;;  %s739_s9 = smov %s544_s10 }
  0xae   : > { %p15_p2 = scmp.ge.s32.totalorder %s18_s14, 4   ;;  %s740_s10 = smov %s548_s11 }
  0xaf   : > { %s741_s11 = smov %s639_s23  ;;  %s742_s12 = smov %s556_s13 }
  0xb0   : > { %s743_s13 = smov %s745_s17  ;;  %17 = sbr.rel (!%p15_p2) target bundleno = 6 (0x6), region = 73 }
  0xb5   :  { %287 = vsyncpa [#allocation3], 1 }
  0xb6   :  { %289 = vsyncpa [#allocation3 + $0x1], 1 }
  0xb7   :  { %290 = vsyncpa [#allocation4], 1 }
  0xb8   :  { %292 = vsyncpa [#allocation4 + $0x1], 1 }

</bundles_post_ra>
